<compile_context>
chip_gen: v7x
topology: tpu7x:2x2x1
jax: 0.10.0
libtpu: 0.0.40
codegen_flags: <defaults>
</compile_context>

<pallas_src>
import jax
import jax.numpy as jnp
from jax.experimental import pallas as pl
from jax.experimental.pallas import tpu as pltpu


def tlam_kernel(y_ref, w1_ref, b1_ref, w2_ref, b2_ref, o_ref):
    # y block: (TB, S*L), lane-dense.
    y = y_ref[...]

    # mean-over-S is folded into w1_eff:  h = mean_S(Y) @ W1.T + b1
    h = jnp.dot(y, w1_ref[...], preferred_element_type=jnp.float32) + b1_ref[...]
    # LeakyReLU (default negative_slope = 0.01)
    h = jnp.where(h > 0, h, 0.01 * h)                               # (TB, H)

    # Conv1d(H, L, 1) with weights/bias pre-tiled over S, then Sigmoid.
    logits = jnp.dot(h, w2_ref[...],
                     preferred_element_type=jnp.float32) + b2_ref[...]   # (TB, S*L)
    gain = jax.nn.sigmoid(logits) + 1.0     # residual folded: out = y*(a+1)

    o_ref[...] = y * gain


def _pick_block_rows(B, row_bytes, target_bytes=2 * 1024 * 1024):
    """Rows of the flattened (B, S*L) array processed per grid step."""
    tb = max(1, min(B, target_bytes // max(row_bytes, 1)))
    if B >= 2:
        # keep >= 2 grid steps so both v7x TensorCores get a share of the batch
        tb = min(tb, max(1, B // 2))
    if tb >= 8:
        tb = (tb // 8) * 8          # sublane-aligned blocks
    while B % tb:                   # exact grid, no padded tail block
        tb -= 1
    return tb


def tlam_forward(y, w1, b1, w2, b2, *, block_rows=None):
    """y: (B, S, L) float32. w1: (L//2, L), b1: (L//2,), w2: (L, L//2), b2: (L,)."""
    B, S, L = y.shape
    H = w1.shape[0]
    SL = S * L

    # Flatten Y so the kernel's lane dimension is S*L (lane-dense when
    # S*L % 128 == 0; always legal since the block spans the full dim).
    y2 = jnp.asarray(y, jnp.float32).reshape(B, SL)

    # Fold mean-over-S into the first conv:  Y_flat @ w1_eff == mean_S(Y) @ W1.T
    w1t = jnp.asarray(w1, jnp.float32).T                   # (L, H)
    w1_eff = jnp.tile(w1t, (S, 1)) / float(S)              # (S*L, H)
    b1_eff = jnp.asarray(b1, jnp.float32).reshape(1, H)

    # Pre-tile second conv over S so the gain comes out flat / lane-dense.
    w2t = jnp.asarray(w2, jnp.float32).T                   # (H, L)
    w2_eff = jnp.tile(w2t, (1, S))                         # (H, S*L)
    b2_eff = jnp.tile(jnp.asarray(b2, jnp.float32), S).reshape(1, SL)

    tb = block_rows or _pick_block_rows(B, SL * 4)
    grid = (B // tb,)

    grid_spec = pltpu.PrefetchScalarGridSpec(
        num_scalar_prefetch=0,
        grid=grid,
        in_specs=[
            pl.BlockSpec((tb, SL), lambda i: (i, 0)),      # Y rows (lane-dense)
            pl.BlockSpec((SL, H), lambda i: (0, 0)),       # folded W1 (resident)
            pl.BlockSpec((1, H), lambda i: (0, 0)),        # b1
            pl.BlockSpec((H, SL), lambda i: (0, 0)),       # tiled W2 (resident)
            pl.BlockSpec((1, SL), lambda i: (0, 0)),       # tiled b2
        ],
        out_specs=pl.BlockSpec((tb, SL), lambda i: (i, 0)),
    )

    # Note: input_output_aliases={0: 0} could alias Y onto the output when the
    # caller donates Y (out = y * gain reads each element exactly once).
    out = pl.pallas_call(
        tlam_kernel,
        out_shape=jax.ShapeDtypeStruct((B, SL), jnp.float32),
        grid_spec=grid_spec,
        compiler_params=pltpu.CompilerParams(
            dimension_semantics=("parallel",),
            vmem_limit_bytes=48 * 1024 * 1024,
        ),
    )(y2, w1_eff, b1_eff, w2_eff, b2_eff)

    return out.reshape(B, S, L)


def tlam_reference(y, w1, b1, w2, b2):
    """Pure-JAX reference mirroring the PyTorch forward."""
    m = jnp.mean(y, axis=1)                               # (B, L)
    h = m @ w1.T + b1                                     # (B, H)
    h = jnp.where(h > 0, h, 0.01 * h)
    a = jax.nn.sigmoid(h @ w2.T + b2)                     # (B, L)
    return y * a[:, None, :] + y


if __name__ == "__main__":
    B, S, L = 16, 16, 32         # Y: (batch, seq, input_length); S*L = 512 lanes
    H = L // 2

    key = jax.random.PRNGKey(0)
    k_y, k_w1, k_b1, k_w2, k_b2 = jax.random.split(key, 5)

    y = jax.random.normal(k_y, (B, S, L), dtype=jnp.float32)
    # Conv1d(L, H, 1) weight (H, L, 1) -> squeeze kernel dim; deterministic init.
    w1 = jax.random.normal(k_w1, (H, L), dtype=jnp.float32) * 0.1
    b1 = jax.random.normal(k_b1, (H,), dtype=jnp.float32) * 0.1
    # Conv1d(H, L, 1) weight (L, H, 1) -> squeeze kernel dim.
    w2 = jax.random.normal(k_w2, (L, H), dtype=jnp.float32) * 0.1
    b2 = jax.random.normal(k_b2, (L,), dtype=jnp.float32) * 0.1

    out = tlam_forward(y, w1, b1, w2, b2)
    out = jax.block_until_ready(out)

    ref = tlam_reference(y, w1, b1, w2, b2)
    assert out.shape == (B, S, L)
    assert jnp.allclose(out, ref, atol=2e-5, rtol=2e-5), "mismatch vs reference"

    print("KERNEL_OK")
</pallas_src>

<mosaic_0001>
module attributes {stable_mosaic.version = 11 : i64} {
  func.func @tlam_kernel(%arg0: i32, %arg1: memref<8x512xf32, #tpu.memory_space<vmem>>, %arg2: memref<512x16xf32, #tpu.memory_space<vmem>>, %arg3: memref<1x16xf32, #tpu.memory_space<vmem>>, %arg4: memref<16x512xf32, #tpu.memory_space<vmem>>, %arg5: memref<1x512xf32, #tpu.memory_space<vmem>>, %arg6: memref<8x512xf32, #tpu.memory_space<vmem>>) attributes {dimension_semantics = [#tpu.dimension_semantics<parallel>], iteration_bounds = array<i64: 2>, scalar_prefetch = 0 : i64, scratch_operands = 0 : i64, tpu.core_type = #tpu.core_type<tc>, window_params = [{transform_indices = @transform_0, window_bounds = array<i64: 8, 512>}, {pipeline_mode = #tpu.pipeline_mode<synchronous>, transform_indices = @transform_1, window_bounds = array<i64: 512, 16>}, {pipeline_mode = #tpu.pipeline_mode<synchronous>, transform_indices = @transform_2, window_bounds = array<i64: 1, 16>}, {pipeline_mode = #tpu.pipeline_mode<synchronous>, transform_indices = @transform_3, window_bounds = array<i64: 16, 512>}, {pipeline_mode = #tpu.pipeline_mode<synchronous>, transform_indices = @transform_4, window_bounds = array<i64: 1, 512>}, {transform_indices = @transform_5, window_bounds = array<i64: 8, 512>}]} {
    %c0 = arith.constant 0 : index
    %c0_0 = arith.constant 0 : index
    %0 = vector.load %arg1[%c0, %c0_0] : memref<8x512xf32, #tpu.memory_space<vmem>>, vector<8x512xf32>
    %c0_1 = arith.constant 0 : index
    %c0_2 = arith.constant 0 : index
    %1 = vector.load %arg2[%c0_1, %c0_2] : memref<512x16xf32, #tpu.memory_space<vmem>>, vector<512x16xf32>
    %cst = arith.constant dense<0.000000e+00> : vector<8x16xf32>
    %2 = tpu.matmul %0, %1, %cst {dimension_numbers = #tpu.dot_dimension_numbers<[1], [0], [0], [1], [0, 0, 1, 1], [], []>} : vector<8x512xf32>, vector<512x16xf32>, vector<8x16xf32> -> vector<8x16xf32>
    %c0_3 = arith.constant 0 : index
    %c0_4 = arith.constant 0 : index
    %3 = vector.load %arg3[%c0_3, %c0_4] : memref<1x16xf32, #tpu.memory_space<vmem>>, vector<1x16xf32>
    %4 = vector.broadcast %3 : vector<1x16xf32> to vector<8x16xf32>
    %5 = arith.addf %2, %4 : vector<8x16xf32>
    %cst_5 = arith.constant 0.000000e+00 : f32
    %6 = vector.broadcast %cst_5 : f32 to vector<8x16xf32>
    %7 = arith.cmpf ogt, %5, %6 : vector<8x16xf32>
    %cst_6 = arith.constant 0.00999999977 : f32
    %8 = vector.broadcast %cst_6 : f32 to vector<8x16xf32>
    %9 = arith.mulf %8, %5 : vector<8x16xf32>
    %10 = arith.select %7, %5, %9 : vector<8x16xi1>, vector<8x16xf32>
    %c0_7 = arith.constant 0 : index
    %c0_8 = arith.constant 0 : index
    %11 = vector.load %arg4[%c0_7, %c0_8] : memref<16x512xf32, #tpu.memory_space<vmem>>, vector<16x512xf32>
    %cst_9 = arith.constant dense<0.000000e+00> : vector<8x512xf32>
    %12 = tpu.matmul %10, %11, %cst_9 {dimension_numbers = #tpu.dot_dimension_numbers<[1], [0], [0], [1], [0, 0, 1, 1], [], []>} : vector<8x16xf32>, vector<16x512xf32>, vector<8x512xf32> -> vector<8x512xf32>
    %c0_10 = arith.constant 0 : index
    %c0_11 = arith.constant 0 : index
    %13 = vector.load %arg5[%c0_10, %c0_11] : memref<1x512xf32, #tpu.memory_space<vmem>>, vector<1x512xf32>
    %14 = vector.broadcast %13 : vector<1x512xf32> to vector<8x512xf32>
    %15 = arith.addf %12, %14 : vector<8x512xf32>
    %16 = arith.negf %15 : vector<8x512xf32>
    %17 = math.exp %16 : vector<8x512xf32>
    %cst_12 = arith.constant 1.000000e+00 : f32
    %18 = vector.broadcast %cst_12 : f32 to vector<8x512xf32>
    %19 = arith.addf %18, %17 : vector<8x512xf32>
    %20 = arith.divf %18, %19 : vector<8x512xf32>
    %cst_13 = arith.constant 1.000000e+00 : f32
    %21 = vector.broadcast %cst_13 : f32 to vector<8x512xf32>
    %22 = arith.addf %20, %21 : vector<8x512xf32>
    %23 = arith.mulf %0, %22 : vector<8x512xf32>
    %c0_14 = arith.constant 0 : index
    %c0_15 = arith.constant 0 : index
    %24 = vector.load %arg6[%c0_14, %c0_15] : memref<8x512xf32, #tpu.memory_space<vmem>>, vector<8x512xf32>
    tpu.vector_store %arg6[%c0_14, %c0_15], %23 {strides = array<i32>} : memref<8x512xf32, #tpu.memory_space<vmem>>, vector<8x512xf32>,
    return
  }
  func.func @transform_0(%arg0: i32) -> (i32, i32) {
    %c0_i32 = arith.constant 0 : i32
    %c0_i32_0 = arith.constant 0 : i32
    return %arg0, %c0_i32 : i32, i32
  }
  func.func @transform_1(%arg0: i32) -> (i32, i32) {
    %c0_i32 = arith.constant 0 : i32
    %c0_i32_0 = arith.constant 0 : i32
    %c0_i32_1 = arith.constant 0 : i32
    return %c0_i32, %c0_i32_0 : i32, i32
  }
  func.func @transform_2(%arg0: i32) -> (i32, i32) {
    %c0_i32 = arith.constant 0 : i32
    %c0_i32_0 = arith.constant 0 : i32
    %c0_i32_1 = arith.constant 0 : i32
    return %c0_i32, %c0_i32_0 : i32, i32
  }
  func.func @transform_3(%arg0: i32) -> (i32, i32) {
    %c0_i32 = arith.constant 0 : i32
    %c0_i32_0 = arith.constant 0 : i32
    %c0_i32_1 = arith.constant 0 : i32
    return %c0_i32, %c0_i32_0 : i32, i32
  }
  func.func @transform_4(%arg0: i32) -> (i32, i32) {
    %c0_i32 = arith.constant 0 : i32
    %c0_i32_0 = arith.constant 0 : i32
    %c0_i32_1 = arith.constant 0 : i32
    return %c0_i32, %c0_i32_0 : i32, i32
  }
  func.func @transform_5(%arg0: i32) -> (i32, i32) {
    %c0_i32 = arith.constant 0 : i32
    %c0_i32_0 = arith.constant 0 : i32
    return %arg0, %c0_i32 : i32, i32
  }
}

</mosaic_0001>

<bundles_post_ra>
// kernel: tpu_custom_call.1
= control target key start
LH: loop header
LB: loop body
LE: loop exit
PB: predicated region body
PF: predicated region fallthrough
CT: control target
= control target key end

     0   :  { %10 = vsyncpa [#allocation3], 0  ;;  %s1391_s0 = inlined_call_operand.vmem [shape: f32[16,512], index: 0, kind: input, shape index: {}]   ;;  %s1392_s1 = inlined_call_operand.vmem [shape: f32[512,16], index: 1, kind: input, shape index: {}]   ;;  %s1393_s2 = inlined_call_operand.vmem [shape: f32[1,16], index: 2, kind: input, shape index: {}]   ;;  %s1394_s3 = inlined_call_operand.vmem [shape: f32[16,512], index: 3, kind: input, shape index: {}]   ;;  %s1395_s4 = inlined_call_operand.vmem [shape: f32[1,512], index: 4, kind: input, shape index: {}]   ;;  %s1396_s5 = inlined_call_operand.hbm [shape: f32[16,512], index: 5, kind: output, shape index: {}]  }
   0x1   :  { %12 = vsyncpa [#allocation3 + $0x1], 0  ;;  %s1042_s18 = smov 0   ;;  %s1044_s19 = smov 0  }
   0x2   :  { %s1046_s20 = smov 0   ;;  %s1048_s21 = smov 0  }
   0x3 LB: > { %s1063_s22 = sadd.s32 4294967295, %s1008_s21   ;;  %s727_s23 = sadd.s32 4294967294, %s1008_s21   ;;  %s1008_s21 = sphi %s1048_s21, %s1402_s21   ;;  %s1004_s20 = sphi %s1046_s20, %s1401_s20   ;;  %s1000_s19 = sphi %s1044_s19, %s1400_s19   ;;  %s996_s18 = sphi %s1042_s18, %s1399_s18  }
   0x4   : > { %s1067_s24 = sadd.s32 1, %s1008_s21   ;;  %s135_s25 = sadd.s32 1, %s1004_s20 }
   0x5   : > { %s132_s26 = ssub.s32 %s1008_s21, %s1067_s24  ;;  %p145_p0 = scmp.ne.s32.totalorder %s1004_s20, %s1000_s19 }
   0x6   : > { %p133_p1 = scmp.eq.s32.totalorder %s132_s26, 0  ;;  %p146_p2 = scmp.eq.s32.totalorder %s1063_s22, 1 }
   0x7   : > { %p151_p3 = scmp.ne.s32.totalorder %s1000_s19, %s996_s18  ;;  %p152_p4 = scmp.eq.s32.totalorder %s727_s23, 1 }
   0x8   : > { %s1078_s27 = scalar_select %p133_p1, %s1004_s20, %s135_s25  }
   0x9   : > { %p1080_p5 = por %p146_p2, %p145_p0  ;;  %p1084_p6 = por %p152_p4, %p151_p3 }
   0xa   : > { %p730_p7 = scmp.ge.s32.totalorder %s1008_s21, 1  ;;  %p190_p8 = scmp.lt.s32.totalorder %s1008_s21, 3 }
   0xc   : > { %p191_p9 = pnand %p730_p7, %p190_p8 }
   0xd   : > { %v243_v0 = vld [vmem:[%s1392_s1 + $0x80] sm:$0xff] (!%p191_p9)  ;;  %v244_v1 = vld [vmem:[%s1392_s1 + $0x88] sm:$0xff] (!%p191_p9)  ;;  %v245_v11 = vld [vmem:[%s1392_s1 + $0x90] sm:$0xff] (!%p191_p9)  ;;  %p218_p10 = scmp.lt.s32.totalorder (!%p191_p9), %s1063_s22, 1  ;;  %vm471_vm1 = vcmask (!%p191_p9), 130048   ;;  %s215_s23 = sand.u32 (!%p191_p9), 1, %s1000_s19  }
   0xe   : > { %194 = sbr.rel (%p191_p9) target bundleno = 531 (0x213), region = 40  ;;  %v227_v2 = vld [vmem:[%s1392_s1] sm:$0xff] (!%p191_p9)  ;;  %v818_v3 = vpack.c.bf16 (!%p191_p9), %v244_v1, %v243_v0  ;;  %v228_v4 = vld [vmem:[%s1392_s1 + $0x8] sm:$0xff] (!%p191_p9)  ;;  %v246_v13 = vld [vmem:[%s1392_s1 + $0x98] sm:$0xff] (!%p191_p9)  ;;  %s731_s25 = sshll.u32 (!%p191_p9), %s215_s23, 5 }
   0xf   : > { %v275_v5 = vld [vmem:[%s1392_s1 + $0x180] sm:$0xff] (!%p191_p9)  ;;  %v276_v6 = vld [vmem:[%s1392_s1 + $0x188] sm:$0xff] (!%p191_p9)  ;;  %v820_v7 = vpack.c.bf16 (!%p191_p9), %v228_v4, %v227_v2  ;;  %v229_v14 = vld [vmem:[%s1392_s1 + $0x10] sm:$0xff] (!%p191_p9)  ;;  %v822_v16 = vpack.c.bf16 (!%p191_p9), %v246_v13, %v245_v11  ;;  %s747_s26 = sshll.u32 (!%p191_p9), %s1063_s22, 9  ;;  %s1011_s8 = smov (!%p191_p9), [#allocation2]  }
  0x10   : > { %v850_v8 = vpack.c.bf16 (!%p191_p9), %v276_v6, %v275_v5  ;;  %v259_v9 = vld [vmem:[%s1392_s1 + $0x100] sm:$0xff] (!%p191_p9)  ;;  %v260_v10 = vld [vmem:[%s1392_s1 + $0x108] sm:$0xff] (!%p191_p9)  ;;  %819 = vmatprep.subr.bf16.mxu0 (!%p191_p9), %v818_v3  ;;  %v230_v15 = vld [vmem:[%s1392_s1 + $0x18] sm:$0xff] (!%p191_p9)  ;;  %s950_s10 = sshll.u32 (!%p191_p9), %s1011_s8, 4  ;;  %s951_s10 = int_to_ptr.vmem [resolvable:$false] %s950_s10 }
  0x11   : > { %v852_v12 = vpack.c.bf16 (!%p191_p9), %v260_v10, %v259_v9  ;;  %821 = vmatpush3.bf16.msra.mxu0 (!%p191_p9), %v820_v7  ;;  %v824_v17 = vpack.c.bf16 (!%p191_p9), %v230_v15, %v229_v14  ;;  %v277_v18 = vld [vmem:[%s1392_s1 + $0x190] sm:$0xff] (!%p191_p9)  ;;  %v278_v19 = vld [vmem:[%s1392_s1 + $0x198] sm:$0xff] (!%p191_p9)  ;;  %v247_v23 = vld [vmem:[%s1392_s1 + $0xa0] sm:$0xff] (!%p191_p9)  ;;  %s952_s11 = scalar_lea.vmem (!%p191_p9), %s951_s10, 1024 }
  0x12   : > { %851 = vmatprep.subr.bf16.mxu1 (!%p191_p9), %v850_v8  ;;  %v261_v20 = vld [vmem:[%s1392_s1 + $0x110] sm:$0xff] (!%p191_p9)  ;;  %v854_v21 = vpack.c.bf16 (!%p191_p9), %v278_v19, %v277_v18  ;;  %v262_v22 = vld [vmem:[%s1392_s1 + $0x118] sm:$0xff] (!%p191_p9)  ;;  %v248_v24 = vld [vmem:[%s1392_s1 + $0xa8] sm:$0xff] (!%p191_p9)  ;;  %823 = vmatprep.subr.bf16.mxu0 (!%p191_p9), %v822_v16 }
  0x13   : > { %853 = vmatpush3.bf16.msra.mxu1 (!%p191_p9), %v852_v12  ;;  %v856_v25 = vpack.c.bf16 (!%p191_p9), %v262_v22, %v261_v20  ;;  %v826_v26 = vpack.c.bf16 (!%p191_p9), %v248_v24, %v247_v23  ;;  %v231_v27 = vld [vmem:[%s1392_s1 + $0x20] sm:$0xff] (!%p191_p9)  ;;  %v232_v28 = vld [vmem:[%s1392_s1 + $0x28] sm:$0xff] (!%p191_p9)  ;;  %v249_v35 = vld [vmem:[%s1392_s1 + $0xb0] sm:$0xff] (!%p191_p9) }
  0x14   : > { %v279_v29 = vld [vmem:[%s1392_s1 + $0x1a0] sm:$0xff] (!%p191_p9)  ;;  %855 = vmatprep.subr.bf16.mxu1 (!%p191_p9), %v854_v21  ;;  %v280_v30 = vld [vmem:[%s1392_s1 + $0x1a8] sm:$0xff] (!%p191_p9)  ;;  %v828_v33 = vpack.c.bf16 (!%p191_p9), %v232_v28, %v231_v27  ;;  %v250_v36 = vld [vmem:[%s1392_s1 + $0xb8] sm:$0xff] (!%p191_p9) }
  0x15   : > { %v263_v31 = vld [vmem:[%s1392_s1 + $0x120] sm:$0xff]  ;;  %v264_v32 = vld [vmem:[%s1392_s1 + $0x128] sm:$0xff]  ;;  %825 = vmatpush3.bf16.msra.mxu0 %v824_v17  ;;  %v858_v34 = vpack.c.bf16 %v280_v30, %v279_v29  ;;  %v233_v37 = vld [vmem:[%s1392_s1 + $0x30] sm:$0xff]  ;;  %v830_v39 = vpack.c.bf16 %v250_v36, %v249_v35  ;;  %s1196_s9 = scalar_select %p218_p10, %s1063_s22, 1 }
  0x16   : > { %827 = vmatprep.subr.bf16.mxu0 %v826_v26  ;;  %v860_v38 = vpack.c.bf16 %v264_v32, %v263_v31  ;;  %v234_v40 = vld [vmem:[%s1392_s1 + $0x38] sm:$0xff]  ;;  %v281_v41 = vld [vmem:[%s1392_s1 + $0x1b0] sm:$0xff]  ;;  %v251_v46 = vld [vmem:[%s1392_s1 + $0xc0] sm:$0xff]  ;;  %s654_s22 = scalar_lea.sflag [#allocation3], %s215_s23 }
  0x17   : > { %857 = vmatpush3.bf16.msra.mxu1 %v856_v25  ;;  %v282_v42 = vld [vmem:[%s1392_s1 + $0x1b8] sm:$0xff]  ;;  %v265_v44 = vld [vmem:[%s1392_s1 + $0x130] sm:$0xff]  ;;  %v252_v47 = vld [vmem:[%s1392_s1 + $0xc8] sm:$0xff]  ;;  %v832_v48 = vpack.c.bf16 %v234_v40, %v233_v37  ;;  %s746_s15 = sshll.u32 %s1196_s9, 5 }
  0x18   : > { %859 = vmatprep.subr.bf16.mxu1 %v858_v34  ;;  %v862_v43 = vpack.c.bf16 %v282_v42, %v281_v41  ;;  %v266_v45 = vld [vmem:[%s1392_s1 + $0x138] sm:$0xff]  ;;  %v283_v49 = vld [vmem:[%s1392_s1 + $0x1c0] sm:$0xff]  ;;  %v284_v50 = vld [vmem:[%s1392_s1 + $0x1c8] sm:$0xff]  ;;  %v834_v52 = vpack.c.bf16 %v252_v47, %v251_v46  ;;  %s1250_s14 = scalar_lea.vmem %s1391_s0, %s746_s15  ;;  %s1349_s15 = scalar_lea.hbm %s1396_s5, %s747_s26 }
  0x19   : > { %829 = vmatpush3.bf16.msra.mxu0 %v828_v33  ;;  %v864_v51 = vpack.c.bf16 %v266_v45, %v265_v44  ;;  %v235_v53 = vld [vmem:[%s1392_s1 + $0x40] sm:$0xff]  ;;  %v236_v54 = vld [vmem:[%s1392_s1 + $0x48] sm:$0xff]  ;;  %v866_v56 = vpack.c.bf16 %v284_v50, %v283_v49  ;;  %v253_v58 = vld [vmem:[%s1392_s1 + $0xd0] sm:$0xff] }
  0x1a   : > { %831 = vmatprep.subr.bf16.mxu0 %v830_v39  ;;  %v267_v55 = vld [vmem:[%s1392_s1 + $0x140] sm:$0xff]  ;;  %v268_v57 = vld [vmem:[%s1392_s1 + $0x148] sm:$0xff]  ;;  %v254_v59 = vld [vmem:[%s1392_s1 + $0xd8] sm:$0xff]  ;;  %v836_v62 = vpack.c.bf16 %v236_v54, %v235_v53 }
  0x1b   : > { %861 = vmatpush3.bf16.msra.mxu1 %v860_v38  ;;  %v285_v60 = vld [vmem:[%s1392_s1 + $0x1d0] sm:$0xff]  ;;  %v286_v61 = vld [vmem:[%s1392_s1 + $0x1d8] sm:$0xff]  ;;  %v868_v63 = vpack.c.bf16 %v268_v57, %v267_v55  ;;  %v838_v0 = vpack.c.bf16 %v254_v59, %v253_v58  ;;  %v255_v6 = vld [vmem:[%s1392_s1 + $0xe0] sm:$0xff] }
  0x1c   : > { %863 = vmatprep.subr.bf16.mxu1 %v862_v43  ;;  %v237_v1 = vld [vmem:[%s1392_s1 + $0x50] sm:$0xff]  ;;  %v238_v2 = vld [vmem:[%s1392_s1 + $0x58] sm:$0xff]  ;;  %v870_v4 = vpack.c.bf16 %v286_v61, %v285_v60  ;;  %v256_v7 = vld [vmem:[%s1392_s1 + $0xe8] sm:$0xff]  ;;  %v451_v60 = vlaneseq }
  0x1d   : > { %833 = vmatpush3.bf16.msra.mxu0 %v832_v48  ;;  %v269_v3 = vld [vmem:[%s1392_s1 + $0x150] sm:$0xff]  ;;  %v270_v5 = vld [vmem:[%s1392_s1 + $0x158] sm:$0xff]  ;;  %v287_v8 = vld [vmem:[%s1392_s1 + $0x1e0] sm:$0xff]  ;;  %v840_v10 = vpack.c.bf16 %v238_v2, %v237_v1  ;;  %v842_v14 = vpack.c.bf16 %v256_v7, %v255_v6  ;;  %v1010_v48 = vmov 0.0  }
  0x1e   : > { %835 = vmatprep.subr.bf16.mxu0 %v834_v52  ;;  %v288_v9 = vld [vmem:[%s1392_s1 + $0x1e8] sm:$0xff]  ;;  %v239_v11 = vld [vmem:[%s1392_s1 + $0x60] sm:$0xff]  ;;  %v872_v13 = vpack.c.bf16 %v270_v5, %v269_v3  ;;  %v257_v19 = vld [vmem:[%s1392_s1 + $0xf0] sm:$0xff]  ;;  %v452_v61 = vshrl.u32 %v451_v60, 7 }
  0x1f   : > { %865 = vmatpush3.bf16.msra.mxu1 %v864_v51  ;;  %v240_v12 = vld [vmem:[%s1392_s1 + $0x68] sm:$0xff]  ;;  %v271_v15 = vld [vmem:[%s1392_s1 + $0x160] sm:$0xff]  ;;  %v874_v18 = vpack.c.bf16 %v288_v9, %v287_v8  ;;  %v258_v20 = vld [vmem:[%s1392_s1 + $0xf8] sm:$0xff] }
  0x20   : > { %867 = vmatprep.subr.bf16.mxu1 %v866_v56  ;;  %v272_v16 = vld [vmem:[%s1392_s1 + $0x168] sm:$0xff]  ;;  %v1281_v21 = vld [vmem:[%s1250_s14 + $0x18] sm:$0xff]  ;;  %v289_v22 = vld [vmem:[%s1392_s1 + $0x1f0] sm:$0xff]  ;;  %v844_v24 = vpack.c.bf16 %v240_v12, %v239_v11  ;;  %v846_v26 = vpack.c.bf16 %v258_v20, %v257_v19  ;;  %v457_v1 = vsub.s32 1, %v452_v61  ;;  %v465_v2 = vsub.s32 3, %v452_v61 }
  0x21   : > { %837 = vmatpush3.bf16.msra.mxu0 %v836_v62  ;;  %v1271_v17 = vld [vmem:[%s1250_s14 + $0x8] sm:$0xff]  ;;  %v290_v23 = vld [vmem:[%s1392_s1 + $0x1f8] sm:$0xff]  ;;  %432 = vmatprep.mubr.f32.mxu1 %v1281_v21  ;;  %v876_v25 = vpack.c.bf16 %v272_v16, %v271_v15  ;;  %v241_v27 = vld [vmem:[%s1392_s1 + $0x70] sm:$0xff]  ;;  %v453_v62 = vsub.s32 0, %v452_v61 }
  0x22   : > { %839 = vmatprep.subr.bf16.mxu0 %v838_v0  ;;  %362 = vmatprep.mubr.f32.mxu0 %v1271_v17  ;;  %v242_v28 = vld [vmem:[%s1392_s1 + $0x78] sm:$0xff]  ;;  %v878_v29 = vpack.c.bf16 %v290_v23, %v289_v22  ;;  %v273_v30 = vld [vmem:[%s1392_s1 + $0x170] sm:$0xff]  ;;  %v1303_v34 = vld [vmem:[%s1250_s14] sm:$0xff] }
  0x23   : > { %869 = vmatpush3.bf16.msra.mxu1 %v868_v63  ;;  %v274_v31 = vld [vmem:[%s1392_s1 + $0x178] sm:$0xff]  ;;  %v848_v32 = vpack.c.bf16 %v242_v28, %v241_v27  ;;  %v1306_v35 = vld [vmem:[%s1250_s14 + $0x10] sm:$0xff]  ;;  %v442_v36 = vld [vmem:[%s1394_s3 + $0x8] sm:$0xff]  ;;  %v461_v63 = vsub.s32 2, %v452_v61  ;;  %s217_s14 = scalar_lea.vmem [#allocation2], %s731_s25 }
  0x24   : > { %871 = vmatprep.subr.bf16.mxu1 %v870_v4  ;;  %v880_v33 = vpack.c.bf16 %v274_v31, %v273_v30  ;;  %v446_v37 = vld [vmem:[%s1394_s3 + $0x28] sm:$0xff]  ;;  %v444_v38 = vld [vmem:[%s1394_s3 + $0x18] sm:$0xff]  ;;  %v441_v41 = vld [vmem:[%s1394_s3] sm:$0xff]  ;;  %s668_s30 = sshll.u32 %s217_s14, 4  ;;  %s1351_s30 = int_to_ptr.vmem [resolvable:$true] %s668_s30 }
  0x25   : > { %841 = vmatpush3.bf16.msra.mxu0 %v840_v10  ;;  %v882_v39 = vpack.c.bf16 %v446_v37, %v442_v36  ;;  %v448_v40 = vld [vmem:[%s1394_s3 + $0x38] sm:$0xff]  ;;  %v445_v42 = vld [vmem:[%s1394_s3 + $0x20] sm:$0xff]  ;;  %v443_v45 = vld [vmem:[%s1394_s3 + $0x10] sm:$0xff]  ;;  %s946_s7 = scalar_lea.vmem %s1351_s30, 512  ;;  %p953_p0 = scmp.lt.s32.totalorder %s1351_s30, %s951_s10 }
  0x26   : > { %843 = vmatprep.subr.bf16.mxu0 %v842_v14  ;;  %v886_v43 = vpack.c.bf16 %v448_v40, %v444_v38  ;;  %v884_v44 = vpack.c.bf16 %v445_v42, %v441_v41  ;;  %v447_v46 = vld [vmem:[%s1394_s3 + $0x30] sm:$0xff]  ;;  %v734_v50 = vld [vmem:[%s1393_s2] ss:$0 sm:$0xff]  ;;  %p947_p11 = scmp.ne.s32.totalorder %s1351_s30, %s946_s7  ;;  %p954_p1 = scmp.lt.s32.totalorder %s952_s11, %s946_s7 }
  0x27   : > { %873 = vmatpush3.bf16.msra.mxu1 %v872_v13  ;;  %v888_v47 = vpack.c.bf16 %v447_v46, %v443_v45  ;;  %v449_v0 = vld [vmem:[%s1395_s4] sm:$0xf] }
  0x28   : > { %875 = vmatprep.subr.bf16.mxu1 %v874_v18  ;;  %v454_v3 = vrot.slane %v449_v0, %v453_v62  ;;  %v462_v4 = vrot.slane %v449_v0, %v461_v63  ;;  %v458_v5 = vrot.slane %v449_v0, %v457_v1  ;;  %v466_v6 = vrot.slane %v449_v0, %v465_v2  ;;  %p948_p12 = pnand %p947_p11, %p1080_p5  ;;  %p955_p2 = por %p954_p1, %p953_p0 }
  0x29   : > { %845 = vmatpush3.bf16.msra.mxu0 %v844_v24 }
  0x2a   : > { %847 = vmatprep.subr.bf16.mxu0 %v846_v26  ;;  %p949_p13 = pneg %p948_p12 }
  0x2b   : > { %877 = vmatpush3.bf16.msra.mxu1 %v876_v25 }
  0x2c   : > { %879 = vmatprep.subr.bf16.mxu1 %v878_v29  ;;  %p956_p3 = pnand %p955_p2, %p949_p13 }
  0x2d   : > { %849 = vmatpush3.bf16.msra.mxu0 %v848_v32 }
  0x2e   : > { %883 = vmatprep.subr.bf16.mxu0 %v882_v39 }
  0x2f   : > { %881 = vmatpush3.bf16.msra.mxu1 %v880_v33 }
  0x30   : > { %363 = vmatmul.mubr.f32.vlgmr.msra.gmra.mrb[0].mxu0 %v1303_v34  ;;  %887 = vmatprep.subr.bf16.mxu1 %v886_v43 }
  0x31   : > { %885 = vmatpush1.bf16.msra.mxu0 %v884_v44  ;;  %539 = vmatprep.mubr.f32.mxu0 %v1010_v48 }
  0x32   : > { %433 = vmatmul.mubr.f32.vlgmr.msra.gmra.mrb[0].mxu1 %v1306_v35 }
  0x33   : > { %889 = vmatpush1.bf16.msra.mxu1 %v888_v47  ;;  %610 = vmatprep.mubr.f32.mxu1 %v1010_v48 }
 0x103   : > { %v780_v49 = vpop.f32.mrb[0].mxu0 }
 0x104   : > { %v781_v51 = vpop.f32.mrb[1].mxu0 }
 0x105   : > { %v815_v52 = vpop.f32.mrb[0].mxu1  ;;  %v782_v53 = vadd.f32 %v781_v51, %v780_v49 }
 0x106   : > { %v816_v54 = vpop.f32.mrb[1].mxu1 }
 0x107   : > { %v817_v55 = vadd.f32 %v816_v54, %v815_v52  ;;  %v365_v56 = vadd.f32 %v782_v53, %v734_v50 }
 0x109   : > { %v435_v57 = vadd.f32 %v817_v55, %v365_v56 }
 0x10b   : > { %vm438_vm0 = vcmp.gt.f32.partialorder %v435_v57, 0.0  ;;  %v439_v58 = vmul.f32 0.01, %v435_v57 }
 0x10d   : > { %v440_v59 = vsel %vm438_vm0, %v435_v57, %v439_v58 }
 0x10e   : > { %735 = vmatmul.mubr.msk.f32.vlgmr.msra.gmra.mrb[2].mxu0 %vm471_vm1, %v440_v59  ;;  %736 = vmatmul.mubr.msk.f32.vlgmr.msra.gmra.mrb[2].mxu1 %vm471_vm1, %v440_v59 }
 0x1e1   : > { %v541_v7 = vpop.f32.mrb[2].mxu0  ;;  %v612_v8 = vpop.f32.mrb[2].mxu1 }
 0x1e2   : > { %v542_v9 = vadd.f32 %v541_v7, %v454_v3  ;;  %v613_v10 = vadd.f32 %v612_v8, %v462_v4  ;;  %v543_v11 = vpop.f32.mrb[3].mxu0  ;;  %v614_v12 = vpop.f32.mrb[3].mxu1 }
 0x1e3   : > { %v544_v13 = vadd.f32 %v543_v11, %v458_v5  ;;  %v615_v14 = vadd.f32 %v614_v12, %v466_v6 }
 0x1e4   : > { %v737_v15 = vmul.f32 -1.442695, %v542_v9  ;;  %v739_v16 = vmul.f32 -1.442695, %v613_v10 }
 0x1e5   : > { %v738_v18 = vmul.f32 -1.442695, %v544_v13  ;;  %v740_v19 = vmul.f32 -1.442695, %v615_v14 }
 0x1e6   : > { %930 = vpow2.f32 %v737_v15 }
 0x1e7   : > { %932 = vpow2.f32 %v739_v16 }
 0x1e8   : > { %934 = vpow2.f32 %v738_v18 }
 0x1e9   : > { %936 = vpow2.f32 %v740_v19 }
 0x1f0   : > { %v931_v20 = vpop.eup %930 }
 0x1f1   : > { %v933_v22 = vpop.eup %932  ;;  %v629_v23 = vadd.f32 1.0, %v931_v20 }
 0x1f2   : > { %v935_v24 = vpop.eup %934  ;;  %v631_v25 = vadd.f32 1.0, %v933_v22 }
 0x1f3   : > { %v937_v26 = vpop.eup %936  ;;  %938 = vrcp.f32 %v629_v23  ;;  %v630_v27 = vadd.f32 1.0, %v935_v24 }
 0x1f4   : > { %940 = vrcp.f32 %v631_v25  ;;  %v632_v28 = vadd.f32 1.0, %v937_v26 }
 0x1f5   : > { %942 = vrcp.f32 %v630_v27 }
 0x1f6   : > { %944 = vrcp.f32 %v632_v28 }
 0x1fd   : > { %v939_v29 = vpop.eup %938 }
 0x1fe   : > { %v941_v30 = vpop.eup %940  ;;  %v641_v31 = vadd.f32 1.0, %v939_v29 }
 0x1ff   : > { %v943_v32 = vpop.eup %942  ;;  %v643_v33 = vadd.f32 1.0, %v941_v30 }
 0x200   : > { %v945_v36 = vpop.eup %944  ;;  %v645_v37 = vmul.f32 %v641_v31, %v1303_v34  ;;  %v642_v38 = vadd.f32 1.0, %v943_v32 }
 0x201   : > { %v647_v39 = vmul.f32 %v643_v33, %v1306_v35  ;;  %v644_v40 = vadd.f32 1.0, %v945_v36 }
 0x202   : > { %649 = vst [vmem:[%s217_s14] sm:$0xff] %v645_v37  ;;  %v646_v41 = vmul.f32 %v642_v38, %v1271_v17 }
 0x203   : > { %651 = vst [vmem:[%s217_s14 + $0x10] sm:$0xff] %v647_v39  ;;  %v648_v42 = vmul.f32 %v644_v40, %v1281_v21 }
 0x204   : > { %650 = vst [vmem:[%s217_s14 + $0x8] sm:$0xff] %v646_v41 }
 0x205   : > { %652 = vst [vmem:[%s217_s14 + $0x18] sm:$0xff] %v648_v42 }
 0x206   : > { %959 = shalt.err (!%p956_p3)
}
 0x207   : > { %s960_s12 = scalar_lea.hbm %s1349_s15, 512  ;;  %s964_s17 = scalar_lea.hbm %s1396_s5, 1024 }
 0x208   : > { %p961_p4 = scmp.ne.s32.totalorder %s1349_s15, %s960_s12  ;;  %p965_p9 = scmp.lt.u32.totalorder %s1349_s15, %s1396_s5 }
 0x209   : > { %p966_p10 = scmp.lt.u32.totalorder %s964_s17, %s960_s12  ;;  %p968_p12 = scmp.lt.u32.totalorder %s960_s12, %s1349_s15 }
 0x20a   : > { %p962_p7 = pnand %p961_p4, %p1080_p5 }
 0x20b   : > { %p967_p11 = por %p966_p10, %p965_p9 }
 0x20c   : > { %p963_p8 = pneg %p962_p7 }
 0x20d   : > { %p969_p13 = por %p968_p12, %p967_p11 }
 0x20f   : > { %p970_p0 = pnand %p969_p13, %p963_p8 }
 0x211   : > { %973 = shalt.err (!%p970_p0)
}
 0x212   : > { %890 = dma.vmem_to_hbm [thread:$0]  (%p1080_p5), %s1351_s30, 512, %s1349_s15, %s654_s22  }
 0x213 PF: > { %p896_p1 = scmp.ge.s32.totalorder %s1008_s21, 2  ;;  %s680_s26 = sand.u32 1, %s996_s18  }
 0x214   : > { %s681_s14 = scalar_lea.sflag [#allocation3], %s680_s26 }
 0x215   : > { %p893_p2 = pnand %p896_p1, %p1084_p6 }
 0x217   : > { %991 = dma.done.wait (!%p893_p2), %s681_s14, 512  }
 0x218   : > { %993 = vsyncadd (!%p893_p2), %s681_s14, 4294966784  ;;  %p15_p3 = scmp.ge.s32.totalorder %s1067_s24, 4   ;;  %s1399_s18 = smov %s1000_s19 }
 0x219   : > { %s1400_s19 = smov %s1004_s20  ;;  %s1401_s20 = smov %s1078_s27 }
 0x21a   : > { %s1402_s21 = smov %s1067_s24  ;;  %17 = sbr.rel (!%p15_p3) target bundleno = 3 (0x3), region = 75 }
 0x221   :  { %686 = vsyncpa [#allocation3], 1 }
 0x222   :  { %688 = vsyncpa [#allocation3 + $0x1], 1 }

</bundles_post_ra>
